<compile_context>
chip_gen: v5e
topology: v5e:2x2
jax: 0.10.0
libtpu: 0.0.40
codegen_flags: <defaults>
</compile_context>

<pallas_src>
import functools
import math

import jax
import jax.numpy as jnp
from jax.experimental import pallas as pl
from jax.experimental.pallas import tpu as pltpu

_LANE = 128
_SUBLANE = 8


def _round_up(x, m):
    return ((x + m - 1) // m) * m


def _vmem_budget_bytes():
    """Generation-aware usable VMEM (capacity minus ~4 MiB Mosaic headroom)."""
    try:
        cap = int(pltpu.get_tpu_info().vmem_capacity_bytes)
    except Exception:
        cap = 64 * 1024 * 1024          # conservative default (v7x per-TC size)
    return max(cap - 4 * 1024 * 1024, 16 * 1024 * 1024)


def _choose_row_tiling(M, tm_cap):
    """Single source of truth for (tm, M_pad): tm % 8 == 0, M_pad % tm == 0,
    and >=2 row tiles whenever possible so the 'parallel' axis can shard
    across both v7x TensorCores."""
    m8 = _round_up(max(M, 1), _SUBLANE)
    tm = min(m8, max(_SUBLANE, (int(tm_cap) // _SUBLANE) * _SUBLANE), 1024)
    if m8 >= 2 * _SUBLANE:
        tm = min(tm, _round_up(m8, 2 * _SUBLANE) // 2)
    tm = max(_SUBLANE, (tm // _SUBLANE) * _SUBLANE)
    m_pad = _round_up(m8, tm)
    return tm, m_pad


def _pick_feature_tile(dim_pad, pref=512):
    """Largest multiple of 128 that divides dim_pad, capped at `pref`."""
    t = max(_LANE, (min(pref, dim_pad) // _LANE) * _LANE)
    while t > _LANE and dim_pad % t != 0:
        t -= _LANE
    return t


def _resident_spec(shape):
    """BlockSpec for a VMEM-resident operand (constant block index).
    Single-buffered: it is DMA'd once, so a second pipeline buffer is waste."""
    try:
        return pl.BlockSpec(shape, lambda i: (0, 0), pipeline_mode=pl.Buffered(1))
    except TypeError:            # older API without pipeline_mode kwarg
        return pl.BlockSpec(shape, lambda i: (0, 0))


# ----------------------------------------------------------------------------
# Fully fused path: whole MLP in one kernel, weights resident in VMEM.
# ----------------------------------------------------------------------------
def _fused_mlp_kernel(*refs, n_layers, compute_dtype):
    """refs = (x_ref, w_0, b_0, ..., w_{L-1}, b_{L-1}, o_ref).

    x_ref : (tm, K0_pad)        activation tile for this grid step
    w_l   : (K_l_pad, N_l_pad)  padded, pre-transposed bf16 weight (resident)
    b_l   : (1, N_l_pad)        padded f32 bias (resident)
    o_ref : (tm, N_last_pad)    lane-dense output tile
    """
    x_ref = refs[0]
    o_ref = refs[1 + 2 * n_layers]

    h = x_ref[...].astype(compute_dtype)          # cast once, feed MXU bf16
    for li in range(n_layers):
        w = refs[1 + 2 * li][...]
        b = refs[2 + 2 * li][...]
        y = jnp.dot(h, w, preferred_element_type=jnp.float32)   # f32 accumulate
        y = y + b.astype(jnp.float32)
        if li < n_layers - 1:                     # no ReLU after the final Linear
            y = jnp.maximum(y, 0.0)
            h = y.astype(compute_dtype)
        else:
            h = y
    o_ref[...] = h.astype(o_ref.dtype)


def _fused_mlp_pallas(x2d_pad, padded_params, out_dtype, *, tm, compute_dtype,
                      vmem_limit):
    M_pad, K0 = x2d_pad.shape
    n_layers = len(padded_params)
    N_last = padded_params[-1][0].shape[1]
    assert tm % _SUBLANE == 0 and M_pad % tm == 0

    in_specs = [pl.BlockSpec((tm, K0), lambda i: (i, 0))]
    args = [x2d_pad]
    for (w, b) in padded_params:
        Kp, Np = w.shape
        in_specs.append(_resident_spec((Kp, Np)))
        in_specs.append(_resident_spec((1, Np)))
        args.append(w)
        args.append(b)

    kernel = functools.partial(_fused_mlp_kernel,
                               n_layers=n_layers,
                               compute_dtype=compute_dtype)

    return pl.pallas_call(
        kernel,
        out_shape=jax.ShapeDtypeStruct((M_pad, N_last), out_dtype),
        grid_spec=pltpu.PrefetchScalarGridSpec(
            num_scalar_prefetch=0,
            grid=(M_pad // tm,),
            in_specs=in_specs,
            out_specs=pl.BlockSpec((tm, N_last), lambda i: (i, 0)),
        ),
        compiler_params=pltpu.CompilerParams(
            dimension_semantics=("parallel",),     # shard row tiles across TCs
            vmem_limit_bytes=int(vmem_limit),
        ),
    )(*args)


# ----------------------------------------------------------------------------
# Fallback path: per-layer (M, N, K)-tiled matmul + bias (+ReLU) pipeline,
# used when resident weights exceed the per-generation VMEM budget.
# ----------------------------------------------------------------------------
def _layer_matmul_kernel(x_ref, w_ref, b_ref, o_ref, acc_ref, *, apply_relu):
    @pl.when(pl.program_id(2) == 0)
    def _init():
        acc_ref[...] = jnp.zeros_like(acc_ref)

    acc_ref[...] += jnp.dot(x_ref[...], w_ref[...],
                            preferred_element_type=jnp.float32)

    @pl.when(pl.program_id(2) == pl.num_programs(2) - 1)
    def _finish():
        y = acc_ref[...] + b_ref[...].astype(jnp.float32)
        if apply_relu:
            y = jnp.maximum(y, 0.0)
        o_ref[...] = y.astype(o_ref.dtype)


def _layer_matmul_pallas(x, w, b, *, apply_relu, out_dtype, tm, vmem_limit):
    M, K = x.shape
    _, N = w.shape
    tn = _pick_feature_tile(N, 512)
    tk = _pick_feature_tile(K, 512)
    kernel = functools.partial(_layer_matmul_kernel, apply_relu=apply_relu)
    return pl.pallas_call(
        kernel,
        out_shape=jax.ShapeDtypeStruct((M, N), out_dtype),
        grid_spec=pltpu.PrefetchScalarGridSpec(
            num_scalar_prefetch=0,
            grid=(M // tm, N // tn, K // tk),
            in_specs=[pl.BlockSpec((tm, tk), lambda i, j, k: (i, k)),
                      pl.BlockSpec((tk, tn), lambda i, j, k: (k, j)),
                      pl.BlockSpec((1, tn), lambda i, j, k: (0, j))],
            out_specs=pl.BlockSpec((tm, tn), lambda i, j, k: (i, j)),
            scratch_shapes=[pltpu.VMEM((tm, tn), jnp.float32)],
        ),
        compiler_params=pltpu.CompilerParams(
            dimension_semantics=("parallel", "parallel", "arbitrary"),
            vmem_limit_bytes=int(vmem_limit),
        ),
    )(x, w, b)


# ----------------------------------------------------------------------------
# Parameter preparation (hoisted out of the per-call path) and forward.
# ----------------------------------------------------------------------------
def init_mlp_params(key, in_dim, out_dim, hidden_list):
    """PyTorch-style uniform(+-1/sqrt(fan_in)) init; returns [(W(out,in), b(out,))]."""
    dims = [in_dim] + list(hidden_list) + [out_dim]
    params = []
    for i in range(len(dims) - 1):
        fan_in, fan_out = dims[i], dims[i + 1]
        key, kw, kb = jax.random.split(key, 3)
        bound = 1.0 / math.sqrt(fan_in)
        w = jax.random.uniform(kw, (fan_out, fan_in), jnp.float32, -bound, bound)
        b = jax.random.uniform(kb, (fan_out,), jnp.float32, -bound, bound)
        params.append((w, b))
    return params


def prepare_mlp_params(params, compute_dtype=jnp.bfloat16):
    """One-time pad + transpose + cast of the PyTorch-layout weights.

    Feature dims are padded to multiples of 128 (lane-dense, (8,128)-legal);
    weights go to bf16 (halves resident VMEM and HBM->VMEM DMA), bias stays f32.
    """
    dims = [params[0][0].shape[1]] + [w.shape[0] for w, _ in params]
    dims_pad = [_round_up(max(d, 1), _LANE) for d in dims]
    padded = []
    for li, (w, b) in enumerate(params):
        out_d, in_d = w.shape
        Kp, Np = dims_pad[li], dims_pad[li + 1]
        w_t = jnp.zeros((Kp, Np), compute_dtype).at[:in_d, :out_d].set(
            w.T.astype(compute_dtype))
        b_p = jnp.zeros((1, Np), jnp.float32).at[:, :out_d].set(
            b.reshape(1, -1).astype(jnp.float32))
        padded.append((w_t, b_p))
    return padded, dims, dims_pad


def mlp_forward(x, prepared, *, compute_dtype=jnp.bfloat16):
    """Equivalent of Linear.forward on prepared (padded/cast) parameters."""
    padded_params, dims, dims_pad = prepared
    in_dim, out_dim = dims[0], dims[-1]
    orig_shape = x.shape
    x2d = x.reshape(-1, in_dim)
    M = x2d.shape[0]
    out_dtype = x.dtype

    budget = _vmem_budget_bytes()
    x_bytes = jnp.dtype(x.dtype).itemsize
    o_bytes = jnp.dtype(out_dtype).itemsize
    c_bytes = jnp.dtype(compute_dtype).itemsize
    max_cols = max(dims_pad[1:])

    # Per-row VMEM that scales with tm: double-buffered in/out tiles plus the
    # in-kernel f32 (y) and compute-dtype (h) per-layer temporaries.
    per_row = (2 * dims_pad[0] * x_bytes + 2 * dims_pad[-1] * o_bytes
               + 2 * max_cols * 4 + max_cols * c_bytes)
    # Single-buffered resident weights (bf16) + biases (f32).
    resident = sum(int(w.size) * w.dtype.itemsize + int(b.size) * b.dtype.itemsize
                   for w, b in padded_params)

    fused_ok = resident + _SUBLANE * per_row <= int(0.9 * budget)

    if fused_ok:
        avail = int(0.9 * budget) - resident
        tm, M_pad = _choose_row_tiling(M, avail // max(per_row, 1))
        x_pad = jnp.zeros((M_pad, dims_pad[0]), x2d.dtype).at[:M, :in_dim].set(x2d)
        vmem_limit = min(budget,
                         max(32 * 1024 * 1024,
                             int(1.3 * (resident + tm * per_row))))
        out_pad = _fused_mlp_pallas(x_pad, padded_params, out_dtype,
                                    tm=tm, compute_dtype=compute_dtype,
                                    vmem_limit=vmem_limit)
    else:
        # Weights too large to stay VMEM-resident (e.g. v7x 64 MiB/TC):
        # per-layer tiled matmul pipeline; inter-layer activations stay bf16.
        tm, M_pad = _choose_row_tiling(M, 512)
        h = jnp.zeros((M_pad, dims_pad[0]), compute_dtype).at[:M, :in_dim].set(
            x2d.astype(compute_dtype))
        for li, (w, b) in enumerate(padded_params):
            is_last = li == len(padded_params) - 1
            h = _layer_matmul_pallas(
                h, w, b, apply_relu=not is_last,
                out_dtype=(out_dtype if is_last else compute_dtype),
                tm=tm, vmem_limit=budget)
        out_pad = h

    out = out_pad[:M, :out_dim].astype(out_dtype)
    return out.reshape(*orig_shape[:-1], out_dim)


if __name__ == "__main__":
    # Module config consistent with Linear(in_dim, out_dim, hidden_list).
    in_dim, out_dim, hidden_list = 32, 16, [64, 64]
    batch = 8

    key = jax.random.PRNGKey(0)
    key, kx = jax.random.split(key)
    x = jax.random.normal(kx, (batch, in_dim), jnp.float32)
    params = init_mlp_params(key, in_dim, out_dim, hidden_list)

    # Pad/transpose/cast weights ONCE (hoisted out of the per-call path).
    prepared = prepare_mlp_params(params, compute_dtype=jnp.bfloat16)
    fwd = jax.jit(lambda xx: mlp_forward(xx, prepared,
                                         compute_dtype=jnp.bfloat16))

    y = jax.block_until_ready(fwd(x))

    # Plain-JAX f32 reference (PyTorch semantics: x @ W.T + b, ReLU between).
    ref = x
    for li, (w, b) in enumerate(params):
        ref = ref @ w.T + b
        if li < len(params) - 1:
            ref = jnp.maximum(ref, 0.0)

    assert y.shape == (batch, out_dim)
    err = float(jnp.max(jnp.abs(y - ref)))
    # bf16 MXU inputs with f32 accumulation -> relaxed tolerance vs f32 ref.
    assert err < 5e-2, f"max abs err {err}"

    print("KERNEL_OK")
</pallas_src>

<mosaic_0001>
module attributes {stable_mosaic.version = 11 : i64} {
  func.func @_fused_mlp_kernel(%arg0: i32, %arg1: memref<8x128xf32, #tpu.memory_space<vmem>>, %arg2: memref<128x128xbf16, #tpu.memory_space<vmem>>, %arg3: memref<1x128xf32, #tpu.memory_space<vmem>>, %arg4: memref<128x128xbf16, #tpu.memory_space<vmem>>, %arg5: memref<1x128xf32, #tpu.memory_space<vmem>>, %arg6: memref<128x128xbf16, #tpu.memory_space<vmem>>, %arg7: memref<1x128xf32, #tpu.memory_space<vmem>>, %arg8: memref<8x128xf32, #tpu.memory_space<vmem>>) attributes {dimension_semantics = [#tpu.dimension_semantics<parallel>], iteration_bounds = array<i64: 1>, scalar_prefetch = 0 : i64, scratch_operands = 0 : i64, tpu.core_type = #tpu.core_type<tc>, window_params = [{transform_indices = @transform_0, window_bounds = array<i64: 8, 128>}, {pipeline_mode = #tpu.pipeline_mode<synchronous>, transform_indices = @transform_1, window_bounds = array<i64: 128, 128>}, {pipeline_mode = #tpu.pipeline_mode<synchronous>, transform_indices = @transform_2, window_bounds = array<i64: 1, 128>}, {pipeline_mode = #tpu.pipeline_mode<synchronous>, transform_indices = @transform_3, window_bounds = array<i64: 128, 128>}, {pipeline_mode = #tpu.pipeline_mode<synchronous>, transform_indices = @transform_4, window_bounds = array<i64: 1, 128>}, {pipeline_mode = #tpu.pipeline_mode<synchronous>, transform_indices = @transform_5, window_bounds = array<i64: 128, 128>}, {pipeline_mode = #tpu.pipeline_mode<synchronous>, transform_indices = @transform_6, window_bounds = array<i64: 1, 128>}, {transform_indices = @transform_7, window_bounds = array<i64: 8, 128>}]} {
    %c0 = arith.constant 0 : index
    %c0_0 = arith.constant 0 : index
    %0 = vector.load %arg1[%c0, %c0_0] : memref<8x128xf32, #tpu.memory_space<vmem>>, vector<8x128xf32>
    %1 = arith.truncf %0 : vector<8x128xf32> to vector<8x128xbf16>
    %c0_1 = arith.constant 0 : index
    %c0_2 = arith.constant 0 : index
    %2 = vector.load %arg2[%c0_1, %c0_2] : memref<128x128xbf16, #tpu.memory_space<vmem>>, vector<128x128xbf16>
    %c0_3 = arith.constant 0 : index
    %c0_4 = arith.constant 0 : index
    %3 = vector.load %arg3[%c0_3, %c0_4] : memref<1x128xf32, #tpu.memory_space<vmem>>, vector<1x128xf32>
    %cst = arith.constant dense<0.000000e+00> : vector<8x128xf32>
    %4 = tpu.matmul %1, %2, %cst {dimension_numbers = #tpu.dot_dimension_numbers<[1], [0], [0], [1], [0, 0, 1, 1], [], []>} : vector<8x128xbf16>, vector<128x128xbf16>, vector<8x128xf32> -> vector<8x128xf32>
    %5 = vector.broadcast %3 : vector<1x128xf32> to vector<8x128xf32>
    %6 = arith.addf %4, %5 : vector<8x128xf32>
    %cst_5 = arith.constant 0.000000e+00 : f32
    %7 = vector.broadcast %cst_5 : f32 to vector<8x128xf32>
    %8 = arith.maximumf %6, %7 : vector<8x128xf32>
    %9 = arith.truncf %8 : vector<8x128xf32> to vector<8x128xbf16>
    %c0_6 = arith.constant 0 : index
    %c0_7 = arith.constant 0 : index
    %10 = vector.load %arg4[%c0_6, %c0_7] : memref<128x128xbf16, #tpu.memory_space<vmem>>, vector<128x128xbf16>
    %c0_8 = arith.constant 0 : index
    %c0_9 = arith.constant 0 : index
    %11 = vector.load %arg5[%c0_8, %c0_9] : memref<1x128xf32, #tpu.memory_space<vmem>>, vector<1x128xf32>
    %cst_10 = arith.constant dense<0.000000e+00> : vector<8x128xf32>
    %12 = tpu.matmul %9, %10, %cst_10 {dimension_numbers = #tpu.dot_dimension_numbers<[1], [0], [0], [1], [0, 0, 1, 1], [], []>} : vector<8x128xbf16>, vector<128x128xbf16>, vector<8x128xf32> -> vector<8x128xf32>
    %13 = vector.broadcast %11 : vector<1x128xf32> to vector<8x128xf32>
    %14 = arith.addf %12, %13 : vector<8x128xf32>
    %cst_11 = arith.constant 0.000000e+00 : f32
    %15 = vector.broadcast %cst_11 : f32 to vector<8x128xf32>
    %16 = arith.maximumf %14, %15 : vector<8x128xf32>
    %17 = arith.truncf %16 : vector<8x128xf32> to vector<8x128xbf16>
    %c0_12 = arith.constant 0 : index
    %c0_13 = arith.constant 0 : index
    %18 = vector.load %arg6[%c0_12, %c0_13] : memref<128x128xbf16, #tpu.memory_space<vmem>>, vector<128x128xbf16>
    %c0_14 = arith.constant 0 : index
    %c0_15 = arith.constant 0 : index
    %19 = vector.load %arg7[%c0_14, %c0_15] : memref<1x128xf32, #tpu.memory_space<vmem>>, vector<1x128xf32>
    %cst_16 = arith.constant dense<0.000000e+00> : vector<8x128xf32>
    %20 = tpu.matmul %17, %18, %cst_16 {dimension_numbers = #tpu.dot_dimension_numbers<[1], [0], [0], [1], [0, 0, 1, 1], [], []>} : vector<8x128xbf16>, vector<128x128xbf16>, vector<8x128xf32> -> vector<8x128xf32>
    %21 = vector.broadcast %19 : vector<1x128xf32> to vector<8x128xf32>
    %22 = arith.addf %20, %21 : vector<8x128xf32>
    %c0_17 = arith.constant 0 : index
    %c0_18 = arith.constant 0 : index
    %23 = vector.load %arg8[%c0_17, %c0_18] : memref<8x128xf32, #tpu.memory_space<vmem>>, vector<8x128xf32>
    tpu.vector_store %arg8[%c0_17, %c0_18], %22 {strides = array<i32>} : memref<8x128xf32, #tpu.memory_space<vmem>>, vector<8x128xf32>,
    return
  }
  func.func @transform_0(%arg0: i32) -> (i32, i32) {
    %c0_i32 = arith.constant 0 : i32
    %c0_i32_0 = arith.constant 0 : i32
    return %arg0, %c0_i32 : i32, i32
  }
  func.func @transform_1(%arg0: i32) -> (i32, i32) {
    %c0_i32 = arith.constant 0 : i32
    %c0_i32_0 = arith.constant 0 : i32
    %c0_i32_1 = arith.constant 0 : i32
    return %c0_i32, %c0_i32_0 : i32, i32
  }
  func.func @transform_2(%arg0: i32) -> (i32, i32) {
    %c0_i32 = arith.constant 0 : i32
    %c0_i32_0 = arith.constant 0 : i32
    %c0_i32_1 = arith.constant 0 : i32
    return %c0_i32, %c0_i32_0 : i32, i32
  }
  func.func @transform_3(%arg0: i32) -> (i32, i32) {
    %c0_i32 = arith.constant 0 : i32
    %c0_i32_0 = arith.constant 0 : i32
    %c0_i32_1 = arith.constant 0 : i32
    return %c0_i32, %c0_i32_0 : i32, i32
  }
  func.func @transform_4(%arg0: i32) -> (i32, i32) {
    %c0_i32 = arith.constant 0 : i32
    %c0_i32_0 = arith.constant 0 : i32
    %c0_i32_1 = arith.constant 0 : i32
    return %c0_i32, %c0_i32_0 : i32, i32
  }
  func.func @transform_5(%arg0: i32) -> (i32, i32) {
    %c0_i32 = arith.constant 0 : i32
    %c0_i32_0 = arith.constant 0 : i32
    %c0_i32_1 = arith.constant 0 : i32
    return %c0_i32, %c0_i32_0 : i32, i32
  }
  func.func @transform_6(%arg0: i32) -> (i32, i32) {
    %c0_i32 = arith.constant 0 : i32
    %c0_i32_0 = arith.constant 0 : i32
    %c0_i32_1 = arith.constant 0 : i32
    return %c0_i32, %c0_i32_0 : i32, i32
  }
  func.func @transform_7(%arg0: i32) -> (i32, i32) {
    %c0_i32 = arith.constant 0 : i32
    %c0_i32_0 = arith.constant 0 : i32
    return %arg0, %c0_i32 : i32, i32
  }
}

</mosaic_0001>

<bundles_post_ra>
// kernel: _lambda_.1
= control target key start
LH: loop header
LB: loop body
LE: loop exit
PB: predicated region body
PF: predicated region fallthrough
CT: control target
= control target key end

     0   :  { %12 = vsyncpa [#allocation3], 0  ;;  %s643_s0 = inlined_call_operand.vmem [shape: f32[8,128], index: 0, kind: input, shape index: {}]   ;;  %s644_s1 = inlined_call_operand.hbm [shape: bf16[128,128], index: 1, kind: input, shape index: {}]   ;;  %s645_s2 = inlined_call_operand.vmem [shape: f32[1,128], index: 2, kind: input, shape index: {}]   ;;  %s646_s3 = inlined_call_operand.hbm [shape: bf16[128,128], index: 3, kind: input, shape index: {}]   ;;  %s647_s4 = inlined_call_operand.vmem [shape: f32[1,128], index: 4, kind: input, shape index: {}]   ;;  %s648_s5 = inlined_call_operand.hbm [shape: bf16[128,128], index: 5, kind: input, shape index: {}]   ;;  %s649_s6 = inlined_call_operand.vmem [shape: f32[1,128], index: 6, kind: input, shape index: {}]   ;;  %s650_s7 = inlined_call_operand.hbm [shape: f32[8,128], index: 7, kind: output, shape index: {}]  }
   0x1   :  { %13 = vsyncpa [#allocation6], 0 }
   0x2   :  { %14 = vsyncpa [#allocation4], 0  ;;  %s36_s26 = sshll.u32 %s646_s3, 4  ;;  %s573_s27 = smov [#allocation5]   ;;  %s37_s26 = int_to_ptr.hbm [resolvable:$true] %s36_s26 }
   0x3   :  { %s38_s28 = sshll.u32 %s573_s27, 4  ;;  %s21_s8 = sshll.u32 %s644_s1, 4  ;;  %s39_s28 = int_to_ptr.vmem [resolvable:$true] %s38_s28  ;;  %s22_s8 = int_to_ptr.hbm [resolvable:$true] %s21_s8 }
   0x4   :  { %s574_s9 = smov 64   ;;  %s575_s10 = smov 4  }
   0x5   :  { %44 = dma.hbm_to_vmem [thread:$0]  %s37_s26, 1024, %s39_s28, [#allocation6], %s574_s9, %s574_s9, %s575_s10  }
   0x6   :  { %s576_s11 = smov [#allocation2]   ;;  %s51_s15 = sshll.u32 %s648_s5, 4  ;;  %s52_s15 = int_to_ptr.hbm [resolvable:$true] %s51_s15 }
   0x7   :  { %s23_s12 = sshll.u32 %s576_s11, 4  ;;  %s577_s3 = smov [#allocation7]   ;;  %s24_s12 = int_to_ptr.vmem [resolvable:$true] %s23_s12 }
   0x8   :  { %29 = dma.hbm_to_vmem [thread:$0]  %s22_s8, 1024, %s24_s12, [#allocation3], %s574_s9, %s574_s9, %s575_s10  }
   0x9   :  { %s53_s16 = sshll.u32 %s577_s3, 4  ;;  %s54_s16 = int_to_ptr.vmem [resolvable:$true] %s53_s16 }
   0xa   :  { %59 = dma.hbm_to_vmem [thread:$0]  %s52_s15, 1024, %s54_s16, [#allocation6], %s574_s9, %s574_s9, %s575_s10  }
   0xb   :  { %567 = dma.done.wait [#allocation3], 1024  }
   0xc   :  { %568 = vsyncadd [#allocation3], 4294966272 }
   0xd   :  { %569 = dma.done.wait [#allocation6], 2048  }
   0xe   :  { %570 = vsyncadd [#allocation6], 4294965248  ;;  %v445_v0 = vld [vmem:[#allocation2 + $0x38] sm:$0xff]  ;;  %v444_v1 = vld [vmem:[#allocation2 + $0x30] sm:$0xff]  ;;  %s578_s21 = smov [#allocation8]   ;;  %s331_s25 = sshll.u32 %s650_s7, 4  ;;  %s332_s25 = int_to_ptr.hbm [resolvable:$true] %s331_s25 }
   0xf   :  { %144 = vmatpush.bf16.msra.mxu0 %v445_v0  ;;  %v453_v2 = vld [vmem:[#allocation5 + $0x38] sm:$0xff]  ;;  %v452_v3 = vld [vmem:[#allocation5 + $0x30] sm:$0xff]  ;;  %v443_v4 = vld [vmem:[#allocation2 + $0x28] sm:$0xff]  ;;  %s329_s22 = sshll.u32 %s578_s21, 4  ;;  %s330_s22 = int_to_ptr.vmem [resolvable:$true] %s329_s22 }
  0x10   :  { %227 = vmatpush.bf16.msra.mxu1 %v453_v2  ;;  %v451_v5 = vld [vmem:[#allocation5 + $0x28] sm:$0xff]  ;;  %v442_v6 = vld [vmem:[#allocation2 + $0x20] sm:$0xff]  ;;  %v441_v8 = vld [vmem:[#allocation2 + $0x18] sm:$0xff] }
  0x11   :  { %v450_v7 = vld [vmem:[#allocation5 + $0x20] sm:$0xff]  ;;  %v449_v9 = vld [vmem:[#allocation5 + $0x18] sm:$0xff]  ;;  %v440_v10 = vld [vmem:[#allocation2 + $0x10] sm:$0xff] }
  0x12   :  { %v448_v11 = vld [vmem:[#allocation5 + $0x10] sm:$0xff]  ;;  %v439_v12 = vld [vmem:[#allocation2 + $0x8] sm:$0xff]  ;;  %v438_v13 = vld [vmem:[#allocation2] sm:$0xff] }
  0x13   :  { %145 = vmatpush.bf16.msra.mxu0 %v444_v1  ;;  %v74_v14 = vld [vmem:[%s643_s0] sm:$0xff]  ;;  %v447_v16 = vld [vmem:[#allocation5 + $0x8] sm:$0xff]  ;;  %v461_v18 = vld [vmem:[#allocation7 + $0x38] sm:$0xff] }
  0x14   :  { %228 = vmatpush.bf16.msra.mxu1 %v452_v3  ;;  %v75_v15 = vpack.c.bf16 %v74_v14, %v74_v14  ;;  %v446_v17 = vld [vmem:[#allocation5] sm:$0xff]  ;;  %310 = vmatpush.bf16.msra.mxu2 %v461_v18  ;;  %v460_v19 = vld [vmem:[#allocation7 + $0x30] sm:$0xff]  ;;  %v459_v20 = vld [vmem:[#allocation7 + $0x28] sm:$0xff] }
  0x15   :  { %v458_v21 = vld [vmem:[#allocation7 + $0x20] sm:$0xff]  ;;  %v457_v22 = vld [vmem:[#allocation7 + $0x18] sm:$0xff]  ;;  %v456_v23 = vld [vmem:[#allocation7 + $0x10] sm:$0xff] }
  0x16   :  { %v468_v24 = vld [vmem:[%s645_s2] ss:$0 sm:$0xff]  ;;  %v455_v30 = vld [vmem:[#allocation7 + $0x8] sm:$0xff] }
  0x17   :  { %146 = vmatpush.bf16.msra.mxu0 %v443_v4  ;;  %v454_v31 = vld [vmem:[#allocation7] sm:$0xff] }
  0x18   :  { %229 = vmatpush.bf16.msra.mxu1 %v451_v5  ;;  %311 = vmatpush.bf16.msra.mxu2 %v460_v19  ;;  %v469_v32 = vld [vmem:[%s647_s4] ss:$0 sm:$0xff] }
  0x19   :  { %v470_v38 = vld [vmem:[%s649_s6] ss:$0 sm:$0xff] }
  0x1b   :  { %147 = vmatpush.bf16.msra.mxu0 %v442_v6 }
  0x1c   :  { %230 = vmatpush.bf16.msra.mxu1 %v450_v7  ;;  %312 = vmatpush.bf16.msra.mxu2 %v459_v20 }
  0x1f   :  { %148 = vmatpush.bf16.msra.mxu0 %v441_v8 }
  0x20   :  { %231 = vmatpush.bf16.msra.mxu1 %v449_v9  ;;  %313 = vmatpush.bf16.msra.mxu2 %v458_v21 }
  0x23   :  { %149 = vmatpush.bf16.msra.mxu0 %v440_v10 }
  0x24   :  { %232 = vmatpush.bf16.msra.mxu1 %v448_v11  ;;  %314 = vmatpush.bf16.msra.mxu2 %v457_v22 }
  0x27   :  { %150 = vmatpush.bf16.msra.mxu0 %v439_v12 }
  0x28   :  { %233 = vmatpush.bf16.msra.mxu1 %v447_v16  ;;  %315 = vmatpush.bf16.msra.mxu2 %v456_v23 }
  0x2b   :  { %151 = vmatpush.bf16.msra.mxu0 %v438_v13 }
  0x2c   :  { %234 = vmatpush.bf16.msra.mxu1 %v446_v17  ;;  %316 = vmatpush.bf16.msra.mxu2 %v455_v30 }
  0x2e   :  { %152 = vmatmul.bf16.vlgmr.msra.gmra.mxu0 %v75_v15 }
  0x30   :  { %317 = vmatpush.bf16.msra.mxu2 %v454_v31 }
  0xab   :  { %v153_v25 = vpop.f32.mrf.mxu0 }
  0xac   :  { %v154_v26 = vadd.f32 %v468_v24, %v153_v25 }
  0xae   :  { %v157_v27 = vmax.f32 %v154_v26, 0.0 }
  0xb0   :  { %v158_v28 = vpack.c.bf16 %v157_v27, %v157_v27 }
  0xb2   :  { %235 = vmatmul.bf16.vlgmr.msra.gmra.mxu1 %v158_v28 }
  0xb3   :  { %v155_v29 = vpop.f32.mrf.mxu0 }
 0x12f   :  { %v236_v33 = vpop.f32.mrf.mxu1 }
 0x130   :  { %v237_v34 = vadd.f32 %v469_v32, %v236_v33 }
 0x132   :  { %v240_v35 = vmax.f32 %v237_v34, 0.0 }
 0x134   :  { %v241_v36 = vpack.c.bf16 %v240_v35, %v240_v35 }
 0x136   :  { %318 = vmatmul.bf16.vlgmr.msra.gmra.mxu2 %v241_v36 }
 0x137   :  { %v238_v37 = vpop.f32.mrf.mxu1 }
 0x1b9   :  { %v319_v39 = vpop.f32.mrf.mxu2 }
 0x1ba   :  { %v320_v40 = vadd.f32 %v470_v38, %v319_v39 }
 0x1bc   :  { %323 = vst [vmem:[#allocation8] sm:$0xff] %v320_v40 }
 0x1bd   :  { %334 = dma.vmem_to_hbm [thread:$0]  %s330_s22, 128, %s332_s25, [#allocation4]  }
 0x1c1   :  { %v321_v41 = vpop.f32.mrf.mxu2 }
 0x1c2   :  { %571 = dma.done.wait [#allocation4], 128  }
 0x1c3   :  { %572 = vsyncadd [#allocation4], 4294967168 }
 0x1c4   :  { %339 = vsyncpa [#allocation3], 1 }
 0x1c5   :  { %340 = vsyncpa [#allocation6], 1 }
 0x1c6   :  { %341 = vsyncpa [#allocation4], 1 }

</bundles_post_ra>
